<compile_context>
chip_gen: v7x
topology: tpu7x:2x2x1
jax: 0.10.0
libtpu: 0.0.40
codegen_flags: <defaults>
</compile_context>

<pallas_src>
import functools
import math

import jax
import jax.numpy as jnp
import numpy as np
from jax.experimental import pallas as pl
from jax.experimental.pallas import tpu as pltpu

# ----------------------------- configuration --------------------------------
B = 2                    # batch
T = 8                    # sequence length
C = 32                   # n_embd
N_HEAD = 4
HEAD_DIM = C // N_HEAD
USE_LAYER_NORM = True    # config.use_layer_norm
LN_EPS = 1e-5
# NEG_INF masking is safe ONLY because every query row always has at least one
# unmasked key (its own diagonal entry is same-batch and causal), so no row is
# fully masked and the softmax denominator can never be ~0.  If padding rows
# are ever introduced, revisit this.
NEG_INF = -1e30
_SQRT_HALF = 0.7071067811865476


# ----------------------------- kernel helpers --------------------------------
def _layer_norm(v, g, b):
    mu = jnp.mean(v, axis=-1, keepdims=True)
    c = v - mu
    var = jnp.mean(c * c, axis=-1, keepdims=True)
    return c * jax.lax.rsqrt(var + LN_EPS) * g + b


def _erf_approx(z):
    """Abramowitz & Stegun 7.1.26 (max abs err ~1.5e-7).

    Uses only add/mul/div/exp/select so it is guaranteed to lower on the
    VPU/EUP (lax.erf has no reliable Mosaic lowering)."""
    az = jnp.abs(z)
    t = 1.0 / (1.0 + 0.3275911 * az)
    poly = ((((1.061405429 * t - 1.453152027) * t + 1.421413741) * t
             - 0.284496736) * t + 0.254829592) * t
    e = 1.0 - poly * jnp.exp(-az * az)
    return jnp.where(z < 0.0, -e, e)


def _gelu_exact(u):
    # Matches nn.GELU() default (erf form), not the tanh approximation.
    return 0.5 * u * (1.0 + _erf_approx(u * _SQRT_HALF))


# --------------------------------- kernel ------------------------------------
def _block_kernel(x_ref, w_attn_ref, w_proj_ref, w_fc_ref, w_mlp_ref,
                  vc_ref, bfc_ref, o_ref, *, n_head, use_layer_norm):
    seq, n_embd = x_ref.shape            # (T, C) — one batch slab per grid step
    hd = n_embd // n_head
    cdt = w_attn_ref.dtype               # MXU operand dtype (f32 or bf16)

    def mxdot(a, b):
        # MXU matmul: operands in `cdt`, accumulation always in f32.
        return jax.lax.dot_general(
            a.astype(cdt), b.astype(cdt),
            (((a.ndim - 1,), (0,)), ((), ())),
            preferred_element_type=jnp.float32)

    x = x_ref[...].astype(jnp.float32)

    # Packed (9, C) small-vector operand (one DMA instead of nine).
    vc = vc_ref[...]
    g1, be1 = vc[0:1], vc[1:2]
    g2, be2 = vc[2:3], vc[3:4]
    bq, bk, bv = vc[4:5], vc[5:6], vc[6:7]
    b_proj, b_mlp = vc[7:8], vc[8:9]

    # ---- ln_1 ---------------------------------------------------------------
    h1 = _layer_norm(x, g1, be1) if use_layer_norm else x

    # ---- fused QKV projection: ONE (T,C)@(C,3C) MXU push --------------------
    qkv = mxdot(h1, w_attn_ref[...])                       # (T, 3C) f32
    q = qkv[:, 0:n_embd] + bq                              # 1/sqrt(hd) pre-folded
    k = qkv[:, n_embd:2 * n_embd] + bk
    v = qkv[:, 2 * n_embd:3 * n_embd] + bv

    # ---- causal self-attention: per-batch (T,T) scores ----------------------
    ri = jax.lax.broadcasted_iota(jnp.int32, (seq, seq), 0)
    ci = jax.lax.broadcasted_iota(jnp.int32, (seq, seq), 1)
    causal = ci <= ri

    heads = []
    for h in range(n_head):   # tiny static unroll; use fori_loop(unroll=True) at scale
        sl = slice(h * hd, (h + 1) * hd)
        qh, kh, vh = q[:, sl], k[:, sl], v[:, sl]
        # s[i,j] = sum_d qh[i,d] * kh[j,d]  (q @ k^T without explicit transpose)
        s = jax.lax.dot_general(qh.astype(cdt), kh.astype(cdt),
                                (((1,), (1,)), ((), ())),
                                preferred_element_type=jnp.float32)
        s = jnp.where(causal, s, NEG_INF)
        m = jnp.max(s, axis=-1, keepdims=True)
        p = jnp.exp(s - m)
        p = p / jnp.sum(p, axis=-1, keepdims=True)          # exact division (review)
        heads.append(mxdot(p, vh))                          # (T, hd)

    # Head concat, then a SINGLE (T,C)@(C,C) output projection.
    y = jnp.concatenate(heads, axis=-1)                     # (T, C)
    x1 = x + mxdot(y, w_proj_ref[...]) + b_proj             # attention residual

    # ---- ln_2 + MLP ----------------------------------------------------------
    h2 = _layer_norm(x1, g2, be2) if use_layer_norm else x1
    hid = mxdot(h2, w_fc_ref[...]) + bfc_ref[...]
    hid = _gelu_exact(hid)                                  # f32 elementwise (v5e-safe)
    mlp = mxdot(hid, w_mlp_ref[...]) + b_mlp

    # TODO(synk): attn/resid/MLP dropout are eval-mode no-ops (p=0) and are
    # intentionally not implemented.
    o_ref[...] = (x1 + mlp).astype(o_ref.dtype)


# ------------------------- one-time parameter prep ---------------------------
def prepare_block_params(params, n_head=N_HEAD, mxu_dtype=jnp.float32):
    """One-time parameter re-layout, hoisted out of the per-call path.

    * Folds 1/sqrt(head_dim) into the Q columns of W_attn and into b_q.
    * Packs all (C,)-sized gains/biases into one (9, C) f32 array.
    * Optionally casts the matmul weights to bf16 (f32 accumulation stays in
      the kernel; LN/softmax/GELU stay f32).
    Linear weights are expected PRE-TRANSPOSED as [in, out].
    """
    (g1, be1, w_attn, b_attn, w_proj, b_proj,
     g2, be2, w_fc, b_fc, w_mlp, b_mlp) = params
    n_embd = g1.shape[0]
    scale = 1.0 / math.sqrt(n_embd // n_head)

    col_scale = jnp.concatenate(
        [jnp.full((n_embd,), scale, jnp.float32),
         jnp.ones((2 * n_embd,), jnp.float32)])
    w_attn_s = w_attn.astype(jnp.float32) * col_scale[None, :]
    bq, bk, bv = jnp.split(b_attn, 3)

    vc = jnp.stack([g1, be1, g2, be2, bq * scale, bk, bv, b_proj, b_mlp],
                   axis=0).astype(jnp.float32)              # (9, C)

    return (w_attn_s.astype(mxu_dtype),
            w_proj.astype(mxu_dtype),
            w_fc.astype(mxu_dtype),
            w_mlp.astype(mxu_dtype),
            vc,
            b_fc.reshape(1, -1).astype(jnp.float32))


# -------------------------------- wrapper ------------------------------------
@functools.partial(jax.jit, static_argnames=("n_head", "use_layer_norm"))
def block_forward(x, prepared, n_head=N_HEAD, use_layer_norm=USE_LAYER_NORM):
    """x: (B, T, C) f32.  prepared: output of prepare_block_params()."""
    w_attn, w_proj, w_fc, w_mlp, vc, bfc = prepared
    Bn, Tn, Cn = x.shape

    # Weights/vectors: full-array blocks with a constant index_map — fetched
    # once and kept resident in VMEM across the batch grid.
    full = lambda a: pl.BlockSpec(a.shape, lambda b, _nd=a.ndim: (0,) * _nd)

    return pl.pallas_call(
        functools.partial(_block_kernel, n_head=n_head,
                          use_layer_norm=use_layer_norm),
        out_shape=jax.ShapeDtypeStruct((Bn, Tn, Cn), x.dtype),
        grid=(Bn,),
        in_specs=[pl.BlockSpec((None, Tn, Cn), lambda b: (b, 0, 0)),
                  full(w_attn), full(w_proj), full(w_fc), full(w_mlp),
                  full(vc), full(bfc)],
        out_specs=pl.BlockSpec((None, Tn, Cn), lambda b: (b, 0, 0)),
        compiler_params=pltpu.CompilerParams(
            dimension_semantics=("parallel",)),      # v7x: shard batch over 2 TCs
    )(x, w_attn, w_proj, w_fc, w_mlp, vc, bfc)


# ------------------------------- reference -----------------------------------
def _reference(x, params, use_layer_norm=USE_LAYER_NORM):
    """Pure-JAX mirror of the PyTorch Block.forward (eval mode)."""
    (g1, be1, w_attn, b_attn, w_proj, b_proj,
     g2, be2, w_fc, b_fc, w_mlp, b_mlp) = params
    Bn, Tn, Cn = x.shape
    H, D = N_HEAD, Cn // N_HEAD

    def ln(v, g, b):
        mu = v.mean(-1, keepdims=True)
        var = ((v - mu) ** 2).mean(-1, keepdims=True)
        return (v - mu) / jnp.sqrt(var + LN_EPS) * g + b

    h = ln(x, g1, be1) if use_layer_norm else x
    qkv = h @ w_attn + b_attn
    q, k, v = jnp.split(qkv, 3, axis=-1)
    heads = lambda t: t.reshape(Bn, Tn, H, D).transpose(0, 2, 1, 3)
    q, k, v = heads(q), heads(k), heads(v)
    s = jnp.einsum("bhqd,bhkd->bhqk", q, k) / jnp.sqrt(jnp.float32(D))
    causal = jnp.tril(jnp.ones((Tn, Tn), dtype=bool))
    s = jnp.where(causal, s, -jnp.inf)
    p = jax.nn.softmax(s, axis=-1)
    y = jnp.einsum("bhqk,bhkd->bhqd", p, v).transpose(0, 2, 1, 3).reshape(Bn, Tn, Cn)
    x = x + (y @ w_proj + b_proj)

    h2 = ln(x, g2, be2) if use_layer_norm else x
    hid = jax.nn.gelu(h2 @ w_fc + b_fc, approximate=False)   # exact erf GELU
    return x + (hid @ w_mlp + b_mlp)


# ---------------------------------- main --------------------------------------
if __name__ == "__main__":
    key = jax.random.PRNGKey(0)
    ks = jax.random.split(key, 13)

    x = jax.random.normal(ks[0], (B, T, C), dtype=jnp.float32)
    g1 = 1.0 + 0.1 * jax.random.normal(ks[1], (C,), dtype=jnp.float32)
    be1 = 0.1 * jax.random.normal(ks[2], (C,), dtype=jnp.float32)
    w_attn = 0.02 * jax.random.normal(ks[3], (C, 3 * C), dtype=jnp.float32)
    b_attn = 0.02 * jax.random.normal(ks[4], (3 * C,), dtype=jnp.float32)
    w_proj = 0.02 * jax.random.normal(ks[5], (C, C), dtype=jnp.float32)
    b_proj = 0.02 * jax.random.normal(ks[6], (C,), dtype=jnp.float32)
    g2 = 1.0 + 0.1 * jax.random.normal(ks[7], (C,), dtype=jnp.float32)
    be2 = 0.1 * jax.random.normal(ks[8], (C,), dtype=jnp.float32)
    w_fc = 0.02 * jax.random.normal(ks[9], (C, 4 * C), dtype=jnp.float32)
    b_fc = 0.02 * jax.random.normal(ks[10], (4 * C,), dtype=jnp.float32)
    w_mlp = 0.02 * jax.random.normal(ks[11], (4 * C, C), dtype=jnp.float32)
    b_mlp = 0.02 * jax.random.normal(ks[12], (C,), dtype=jnp.float32)

    params = (g1, be1, w_attn, b_attn, w_proj, b_proj,
              g2, be2, w_fc, b_fc, w_mlp, b_mlp)

    ref = jax.block_until_ready(_reference(x, params))

    # f32 MXU path: exact softmax division (approx reciprocal removed per
    # review).  Tolerance now only covers TPU MXU pass-precision differences
    # between the Mosaic kernel and the plain-jnp reference.
    prep32 = jax.block_until_ready(prepare_block_params(params, mxu_dtype=jnp.float32))
    out32 = jax.block_until_ready(block_forward(x, prep32))
    np.testing.assert_allclose(np.asarray(out32), np.asarray(ref),
                               rtol=2e-4, atol=2e-4)

    # bf16 MXU path (review-recommended default for v6e/v7x at scale):
    # bf16 operands into every dot, f32 accumulation, f32 LN/softmax/GELU.
    prep16 = jax.block_until_ready(prepare_block_params(params, mxu_dtype=jnp.bfloat16))
    out16 = jax.block_until_ready(block_forward(x, prep16))
    np.testing.assert_allclose(np.asarray(out16), np.asarray(ref),
                               rtol=3e-2, atol=3e-2)

    print("KERNEL_OK")
</pallas_src>

<mosaic_0001>
module attributes {stable_mosaic.version = 11 : i64} {
  func.func @_block_kernel(%arg0: i32, %arg1: memref<1x8x32xf32, #tpu.memory_space<vmem>>, %arg2: memref<32x96xf32, #tpu.memory_space<vmem>>, %arg3: memref<32x32xf32, #tpu.memory_space<vmem>>, %arg4: memref<32x128xf32, #tpu.memory_space<vmem>>, %arg5: memref<128x32xf32, #tpu.memory_space<vmem>>, %arg6: memref<9x32xf32, #tpu.memory_space<vmem>>, %arg7: memref<1x128xf32, #tpu.memory_space<vmem>>, %arg8: memref<1x8x32xf32, #tpu.memory_space<vmem>>) attributes {dimension_semantics = [#tpu.dimension_semantics<parallel>], iteration_bounds = array<i64: 2>, scalar_prefetch = 0 : i64, scratch_operands = 0 : i64, tpu.core_type = #tpu.core_type<tc>, window_params = [{transform_indices = @transform_0, window_bounds = array<i64: 1, 8, 32>}, {pipeline_mode = #tpu.pipeline_mode<synchronous>, transform_indices = @transform_1, window_bounds = array<i64: 32, 96>}, {pipeline_mode = #tpu.pipeline_mode<synchronous>, transform_indices = @transform_2, window_bounds = array<i64: 32, 32>}, {pipeline_mode = #tpu.pipeline_mode<synchronous>, transform_indices = @transform_3, window_bounds = array<i64: 32, 128>}, {pipeline_mode = #tpu.pipeline_mode<synchronous>, transform_indices = @transform_4, window_bounds = array<i64: 128, 32>}, {pipeline_mode = #tpu.pipeline_mode<synchronous>, transform_indices = @transform_5, window_bounds = array<i64: 9, 32>}, {pipeline_mode = #tpu.pipeline_mode<synchronous>, transform_indices = @transform_6, window_bounds = array<i64: 1, 128>}, {transform_indices = @transform_7, window_bounds = array<i64: 1, 8, 32>}]} {
    %c0 = arith.constant 0 : index
    %c0_0 = arith.constant 0 : index
    %c0_1 = arith.constant 0 : index
    %0 = vector.load %arg1[%c0, %c0_0, %c0_1] : memref<1x8x32xf32, #tpu.memory_space<vmem>>, vector<1x8x32xf32>
    %1 = vector.shape_cast %0 : vector<1x8x32xf32> to vector<8x32xf32>
    %c0_2 = arith.constant 0 : index
    %c0_3 = arith.constant 0 : index
    %2 = vector.load %arg6[%c0_2, %c0_3] : memref<9x32xf32, #tpu.memory_space<vmem>>, vector<9x32xf32>
    %3 = vector.extract_strided_slice %2 {offsets = [0, 0], sizes = [1, 32], strides = [1, 1]} : vector<9x32xf32> to vector<1x32xf32>
    %4 = vector.extract_strided_slice %2 {offsets = [1, 0], sizes = [1, 32], strides = [1, 1]} : vector<9x32xf32> to vector<1x32xf32>
    %5 = vector.extract_strided_slice %2 {offsets = [2, 0], sizes = [1, 32], strides = [1, 1]} : vector<9x32xf32> to vector<1x32xf32>
    %6 = vector.extract_strided_slice %2 {offsets = [3, 0], sizes = [1, 32], strides = [1, 1]} : vector<9x32xf32> to vector<1x32xf32>
    %7 = vector.extract_strided_slice %2 {offsets = [4, 0], sizes = [1, 32], strides = [1, 1]} : vector<9x32xf32> to vector<1x32xf32>
    %8 = vector.extract_strided_slice %2 {offsets = [5, 0], sizes = [1, 32], strides = [1, 1]} : vector<9x32xf32> to vector<1x32xf32>
    %9 = vector.extract_strided_slice %2 {offsets = [6, 0], sizes = [1, 32], strides = [1, 1]} : vector<9x32xf32> to vector<1x32xf32>
    %10 = vector.extract_strided_slice %2 {offsets = [7, 0], sizes = [1, 32], strides = [1, 1]} : vector<9x32xf32> to vector<1x32xf32>
    %11 = vector.extract_strided_slice %2 {offsets = [8, 0], sizes = [1, 32], strides = [1, 1]} : vector<9x32xf32> to vector<1x32xf32>
    %cst = arith.constant dense<0.000000e+00> : vector<8xf32>
    %12 = vector.multi_reduction <add>, %1, %cst [1] : vector<8x32xf32> to vector<8xf32>
    %13 = vector.shape_cast %12 : vector<8xf32> to vector<8x1xf32>
    %cst_4 = arith.constant 3.200000e+01 : f32
    %14 = vector.broadcast %cst_4 : f32 to vector<8x1xf32>
    %15 = arith.divf %13, %14 : vector<8x1xf32>
    %16 = vector.broadcast %15 : vector<8x1xf32> to vector<8x32xf32>
    %17 = arith.subf %1, %16 : vector<8x32xf32>
    %18 = arith.mulf %17, %17 : vector<8x32xf32>
    %cst_5 = arith.constant dense<0.000000e+00> : vector<8xf32>
    %19 = vector.multi_reduction <add>, %18, %cst_5 [1] : vector<8x32xf32> to vector<8xf32>
    %20 = vector.shape_cast %19 : vector<8xf32> to vector<8x1xf32>
    %cst_6 = arith.constant 3.200000e+01 : f32
    %21 = vector.broadcast %cst_6 : f32 to vector<8x1xf32>
    %22 = arith.divf %20, %21 : vector<8x1xf32>
    %cst_7 = arith.constant 9.99999974E-6 : f32
    %23 = vector.broadcast %cst_7 : f32 to vector<8x1xf32>
    %24 = arith.addf %22, %23 : vector<8x1xf32>
    %25 = math.rsqrt %24 : vector<8x1xf32>
    %26 = vector.broadcast %25 : vector<8x1xf32> to vector<8x32xf32>
    %27 = arith.mulf %17, %26 : vector<8x32xf32>
    %28 = vector.broadcast %3 : vector<1x32xf32> to vector<8x32xf32>
    %29 = arith.mulf %27, %28 : vector<8x32xf32>
    %30 = vector.broadcast %4 : vector<1x32xf32> to vector<8x32xf32>
    %31 = arith.addf %29, %30 : vector<8x32xf32>
    %c0_8 = arith.constant 0 : index
    %c0_9 = arith.constant 0 : index
    %32 = vector.load %arg2[%c0_8, %c0_9] : memref<32x96xf32, #tpu.memory_space<vmem>>, vector<32x96xf32>
    %cst_10 = arith.constant dense<0.000000e+00> : vector<8x96xf32>
    %33 = tpu.matmul %31, %32, %cst_10 {dimension_numbers = #tpu.dot_dimension_numbers<[1], [0], [0], [1], [0, 0, 1, 1], [], []>} : vector<8x32xf32>, vector<32x96xf32>, vector<8x96xf32> -> vector<8x96xf32>
    %34 = vector.extract_strided_slice %33 {offsets = [0, 0], sizes = [8, 32], strides = [1, 1]} : vector<8x96xf32> to vector<8x32xf32>
    %35 = vector.broadcast %7 : vector<1x32xf32> to vector<8x32xf32>
    %36 = arith.addf %34, %35 : vector<8x32xf32>
    %37 = vector.extract_strided_slice %33 {offsets = [0, 32], sizes = [8, 32], strides = [1, 1]} : vector<8x96xf32> to vector<8x32xf32>
    %38 = vector.broadcast %8 : vector<1x32xf32> to vector<8x32xf32>
    %39 = arith.addf %37, %38 : vector<8x32xf32>
    %40 = vector.extract_strided_slice %33 {offsets = [0, 64], sizes = [8, 32], strides = [1, 1]} : vector<8x96xf32> to vector<8x32xf32>
    %41 = vector.broadcast %9 : vector<1x32xf32> to vector<8x32xf32>
    %42 = arith.addf %40, %41 : vector<8x32xf32>
    %43 = tpu.iota {dimensions = array<i32: 0>} : vector<8x8xi32>
    %44 = tpu.iota {dimensions = array<i32: 1>} : vector<8x8xi32>
    %45 = arith.cmpi sle, %44, %43 : vector<8x8xi32>
    %46 = vector.extract_strided_slice %36 {offsets = [0, 0], sizes = [8, 8], strides = [1, 1]} : vector<8x32xf32> to vector<8x8xf32>
    %47 = vector.extract_strided_slice %39 {offsets = [0, 0], sizes = [8, 8], strides = [1, 1]} : vector<8x32xf32> to vector<8x8xf32>
    %48 = vector.extract_strided_slice %42 {offsets = [0, 0], sizes = [8, 8], strides = [1, 1]} : vector<8x32xf32> to vector<8x8xf32>
    %cst_11 = arith.constant dense<0.000000e+00> : vector<8x8xf32>
    %49 = tpu.matmul %46, %47, %cst_11 {dimension_numbers = #tpu.dot_dimension_numbers<[1], [1], [0], [0], [0, 0, 1, 0], [], []>} : vector<8x8xf32>, vector<8x8xf32>, vector<8x8xf32> -> vector<8x8xf32>
    %cst_12 = arith.constant -1.000000e+30 : f32
    %50 = vector.broadcast %cst_12 : f32 to vector<8x8xf32>
    %51 = arith.select %45, %49, %50 : vector<8x8xi1>, vector<8x8xf32>
    %cst_13 = arith.constant dense<0xFF800000> : vector<8xf32>
    %52 = vector.multi_reduction <maximumf>, %51, %cst_13 [1] : vector<8x8xf32> to vector<8xf32>
    %53 = vector.shape_cast %52 : vector<8xf32> to vector<8x1xf32>
    %54 = vector.broadcast %53 : vector<8x1xf32> to vector<8x8xf32>
    %55 = arith.subf %51, %54 : vector<8x8xf32>
    %56 = math.exp %55 : vector<8x8xf32>
    %cst_14 = arith.constant dense<0.000000e+00> : vector<8xf32>
    %57 = vector.multi_reduction <add>, %56, %cst_14 [1] : vector<8x8xf32> to vector<8xf32>
    %58 = vector.shape_cast %57 : vector<8xf32> to vector<8x1xf32>
    %59 = vector.broadcast %58 : vector<8x1xf32> to vector<8x8xf32>
    %60 = arith.divf %56, %59 : vector<8x8xf32>
    %cst_15 = arith.constant dense<0.000000e+00> : vector<8x8xf32>
    %61 = tpu.matmul %60, %48, %cst_15 {dimension_numbers = #tpu.dot_dimension_numbers<[1], [0], [0], [1], [0, 0, 1, 1], [], []>} : vector<8x8xf32>, vector<8x8xf32>, vector<8x8xf32> -> vector<8x8xf32>
    %62 = vector.extract_strided_slice %36 {offsets = [0, 8], sizes = [8, 8], strides = [1, 1]} : vector<8x32xf32> to vector<8x8xf32>
    %63 = vector.extract_strided_slice %39 {offsets = [0, 8], sizes = [8, 8], strides = [1, 1]} : vector<8x32xf32> to vector<8x8xf32>
    %64 = vector.extract_strided_slice %42 {offsets = [0, 8], sizes = [8, 8], strides = [1, 1]} : vector<8x32xf32> to vector<8x8xf32>
    %cst_16 = arith.constant dense<0.000000e+00> : vector<8x8xf32>
    %65 = tpu.matmul %62, %63, %cst_16 {dimension_numbers = #tpu.dot_dimension_numbers<[1], [1], [0], [0], [0, 0, 1, 0], [], []>} : vector<8x8xf32>, vector<8x8xf32>, vector<8x8xf32> -> vector<8x8xf32>
    %cst_17 = arith.constant -1.000000e+30 : f32
    %66 = vector.broadcast %cst_17 : f32 to vector<8x8xf32>
    %67 = arith.select %45, %65, %66 : vector<8x8xi1>, vector<8x8xf32>
    %cst_18 = arith.constant dense<0xFF800000> : vector<8xf32>
    %68 = vector.multi_reduction <maximumf>, %67, %cst_18 [1] : vector<8x8xf32> to vector<8xf32>
    %69 = vector.shape_cast %68 : vector<8xf32> to vector<8x1xf32>
    %70 = vector.broadcast %69 : vector<8x1xf32> to vector<8x8xf32>
    %71 = arith.subf %67, %70 : vector<8x8xf32>
    %72 = math.exp %71 : vector<8x8xf32>
    %cst_19 = arith.constant dense<0.000000e+00> : vector<8xf32>
    %73 = vector.multi_reduction <add>, %72, %cst_19 [1] : vector<8x8xf32> to vector<8xf32>
    %74 = vector.shape_cast %73 : vector<8xf32> to vector<8x1xf32>
    %75 = vector.broadcast %74 : vector<8x1xf32> to vector<8x8xf32>
    %76 = arith.divf %72, %75 : vector<8x8xf32>
    %cst_20 = arith.constant dense<0.000000e+00> : vector<8x8xf32>
    %77 = tpu.matmul %76, %64, %cst_20 {dimension_numbers = #tpu.dot_dimension_numbers<[1], [0], [0], [1], [0, 0, 1, 1], [], []>} : vector<8x8xf32>, vector<8x8xf32>, vector<8x8xf32> -> vector<8x8xf32>
    %78 = vector.extract_strided_slice %36 {offsets = [0, 16], sizes = [8, 8], strides = [1, 1]} : vector<8x32xf32> to vector<8x8xf32>
    %79 = vector.extract_strided_slice %39 {offsets = [0, 16], sizes = [8, 8], strides = [1, 1]} : vector<8x32xf32> to vector<8x8xf32>
    %80 = vector.extract_strided_slice %42 {offsets = [0, 16], sizes = [8, 8], strides = [1, 1]} : vector<8x32xf32> to vector<8x8xf32>
    %cst_21 = arith.constant dense<0.000000e+00> : vector<8x8xf32>
    %81 = tpu.matmul %78, %79, %cst_21 {dimension_numbers = #tpu.dot_dimension_numbers<[1], [1], [0], [0], [0, 0, 1, 0], [], []>} : vector<8x8xf32>, vector<8x8xf32>, vector<8x8xf32> -> vector<8x8xf32>
    %cst_22 = arith.constant -1.000000e+30 : f32
    %82 = vector.broadcast %cst_22 : f32 to vector<8x8xf32>
    %83 = arith.select %45, %81, %82 : vector<8x8xi1>, vector<8x8xf32>
    %cst_23 = arith.constant dense<0xFF800000> : vector<8xf32>
    %84 = vector.multi_reduction <maximumf>, %83, %cst_23 [1] : vector<8x8xf32> to vector<8xf32>
    %85 = vector.shape_cast %84 : vector<8xf32> to vector<8x1xf32>
    %86 = vector.broadcast %85 : vector<8x1xf32> to vector<8x8xf32>
    %87 = arith.subf %83, %86 : vector<8x8xf32>
    %88 = math.exp %87 : vector<8x8xf32>
    %cst_24 = arith.constant dense<0.000000e+00> : vector<8xf32>
    %89 = vector.multi_reduction <add>, %88, %cst_24 [1] : vector<8x8xf32> to vector<8xf32>
    %90 = vector.shape_cast %89 : vector<8xf32> to vector<8x1xf32>
    %91 = vector.broadcast %90 : vector<8x1xf32> to vector<8x8xf32>
    %92 = arith.divf %88, %91 : vector<8x8xf32>
    %cst_25 = arith.constant dense<0.000000e+00> : vector<8x8xf32>
    %93 = tpu.matmul %92, %80, %cst_25 {dimension_numbers = #tpu.dot_dimension_numbers<[1], [0], [0], [1], [0, 0, 1, 1], [], []>} : vector<8x8xf32>, vector<8x8xf32>, vector<8x8xf32> -> vector<8x8xf32>
    %94 = vector.extract_strided_slice %36 {offsets = [0, 24], sizes = [8, 8], strides = [1, 1]} : vector<8x32xf32> to vector<8x8xf32>
    %95 = vector.extract_strided_slice %39 {offsets = [0, 24], sizes = [8, 8], strides = [1, 1]} : vector<8x32xf32> to vector<8x8xf32>
    %96 = vector.extract_strided_slice %42 {offsets = [0, 24], sizes = [8, 8], strides = [1, 1]} : vector<8x32xf32> to vector<8x8xf32>
    %cst_26 = arith.constant dense<0.000000e+00> : vector<8x8xf32>
    %97 = tpu.matmul %94, %95, %cst_26 {dimension_numbers = #tpu.dot_dimension_numbers<[1], [1], [0], [0], [0, 0, 1, 0], [], []>} : vector<8x8xf32>, vector<8x8xf32>, vector<8x8xf32> -> vector<8x8xf32>
    %cst_27 = arith.constant -1.000000e+30 : f32
    %98 = vector.broadcast %cst_27 : f32 to vector<8x8xf32>
    %99 = arith.select %45, %97, %98 : vector<8x8xi1>, vector<8x8xf32>
    %cst_28 = arith.constant dense<0xFF800000> : vector<8xf32>
    %100 = vector.multi_reduction <maximumf>, %99, %cst_28 [1] : vector<8x8xf32> to vector<8xf32>
    %101 = vector.shape_cast %100 : vector<8xf32> to vector<8x1xf32>
    %102 = vector.broadcast %101 : vector<8x1xf32> to vector<8x8xf32>
    %103 = arith.subf %99, %102 : vector<8x8xf32>
    %104 = math.exp %103 : vector<8x8xf32>
    %cst_29 = arith.constant dense<0.000000e+00> : vector<8xf32>
    %105 = vector.multi_reduction <add>, %104, %cst_29 [1] : vector<8x8xf32> to vector<8xf32>
    %106 = vector.shape_cast %105 : vector<8xf32> to vector<8x1xf32>
    %107 = vector.broadcast %106 : vector<8x1xf32> to vector<8x8xf32>
    %108 = arith.divf %104, %107 : vector<8x8xf32>
    %cst_30 = arith.constant dense<0.000000e+00> : vector<8x8xf32>
    %109 = tpu.matmul %108, %96, %cst_30 {dimension_numbers = #tpu.dot_dimension_numbers<[1], [0], [0], [1], [0, 0, 1, 1], [], []>} : vector<8x8xf32>, vector<8x8xf32>, vector<8x8xf32> -> vector<8x8xf32>
    %110 = tpu.concatenate %61, %77, %93, %109 in 1 : vector<8x8xf32>, vector<8x8xf32>, vector<8x8xf32>, vector<8x8xf32> -> vector<8x32xf32>
    %c0_31 = arith.constant 0 : index
    %c0_32 = arith.constant 0 : index
    %111 = vector.load %arg3[%c0_31, %c0_32] : memref<32x32xf32, #tpu.memory_space<vmem>>, vector<32x32xf32>
    %cst_33 = arith.constant dense<0.000000e+00> : vector<8x32xf32>
    %112 = tpu.matmul %110, %111, %cst_33 {dimension_numbers = #tpu.dot_dimension_numbers<[1], [0], [0], [1], [0, 0, 1, 1], [], []>} : vector<8x32xf32>, vector<32x32xf32>, vector<8x32xf32> -> vector<8x32xf32>
    %113 = arith.addf %1, %112 : vector<8x32xf32>
    %114 = vector.broadcast %10 : vector<1x32xf32> to vector<8x32xf32>
    %115 = arith.addf %113, %114 : vector<8x32xf32>
    %cst_34 = arith.constant dense<0.000000e+00> : vector<8xf32>
    %116 = vector.multi_reduction <add>, %115, %cst_34 [1] : vector<8x32xf32> to vector<8xf32>
    %117 = vector.shape_cast %116 : vector<8xf32> to vector<8x1xf32>
    %cst_35 = arith.constant 3.200000e+01 : f32
    %118 = vector.broadcast %cst_35 : f32 to vector<8x1xf32>
    %119 = arith.divf %117, %118 : vector<8x1xf32>
    %120 = vector.broadcast %119 : vector<8x1xf32> to vector<8x32xf32>
    %121 = arith.subf %115, %120 : vector<8x32xf32>
    %122 = arith.mulf %121, %121 : vector<8x32xf32>
    %cst_36 = arith.constant dense<0.000000e+00> : vector<8xf32>
    %123 = vector.multi_reduction <add>, %122, %cst_36 [1] : vector<8x32xf32> to vector<8xf32>
    %124 = vector.shape_cast %123 : vector<8xf32> to vector<8x1xf32>
    %cst_37 = arith.constant 3.200000e+01 : f32
    %125 = vector.broadcast %cst_37 : f32 to vector<8x1xf32>
    %126 = arith.divf %124, %125 : vector<8x1xf32>
    %cst_38 = arith.constant 9.99999974E-6 : f32
    %127 = vector.broadcast %cst_38 : f32 to vector<8x1xf32>
    %128 = arith.addf %126, %127 : vector<8x1xf32>
    %129 = math.rsqrt %128 : vector<8x1xf32>
    %130 = vector.broadcast %129 : vector<8x1xf32> to vector<8x32xf32>
    %131 = arith.mulf %121, %130 : vector<8x32xf32>
    %132 = vector.broadcast %5 : vector<1x32xf32> to vector<8x32xf32>
    %133 = arith.mulf %131, %132 : vector<8x32xf32>
    %134 = vector.broadcast %6 : vector<1x32xf32> to vector<8x32xf32>
    %135 = arith.addf %133, %134 : vector<8x32xf32>
    %c0_39 = arith.constant 0 : index
    %c0_40 = arith.constant 0 : index
    %136 = vector.load %arg4[%c0_39, %c0_40] : memref<32x128xf32, #tpu.memory_space<vmem>>, vector<32x128xf32>
    %cst_41 = arith.constant dense<0.000000e+00> : vector<8x128xf32>
    %137 = tpu.matmul %135, %136, %cst_41 {dimension_numbers = #tpu.dot_dimension_numbers<[1], [0], [0], [1], [0, 0, 1, 1], [], []>} : vector<8x32xf32>, vector<32x128xf32>, vector<8x128xf32> -> vector<8x128xf32>
    %c0_42 = arith.constant 0 : index
    %c0_43 = arith.constant 0 : index
    %138 = vector.load %arg7[%c0_42, %c0_43] : memref<1x128xf32, #tpu.memory_space<vmem>>, vector<1x128xf32>
    %139 = vector.broadcast %138 : vector<1x128xf32> to vector<8x128xf32>
    %140 = arith.addf %137, %139 : vector<8x128xf32>
    %cst_44 = arith.constant 5.000000e-01 : f32
    %141 = vector.broadcast %cst_44 : f32 to vector<8x128xf32>
    %142 = arith.mulf %141, %140 : vector<8x128xf32>
    %cst_45 = arith.constant 0.707106769 : f32
    %143 = vector.broadcast %cst_45 : f32 to vector<8x128xf32>
    %144 = arith.mulf %140, %143 : vector<8x128xf32>
    %145 = math.absf %144 : vector<8x128xf32>
    %cst_46 = arith.constant 0.327591091 : f32
    %146 = vector.broadcast %cst_46 : f32 to vector<8x128xf32>
    %147 = arith.mulf %146, %145 : vector<8x128xf32>
    %cst_47 = arith.constant 1.000000e+00 : f32
    %148 = vector.broadcast %cst_47 : f32 to vector<8x128xf32>
    %149 = arith.addf %148, %147 : vector<8x128xf32>
    %cst_48 = arith.constant 1.000000e+00 : f32
    %150 = vector.broadcast %cst_48 : f32 to vector<8x128xf32>
    %151 = arith.divf %150, %149 : vector<8x128xf32>
    %cst_49 = arith.constant 1.06140542 : f32
    %152 = vector.broadcast %cst_49 : f32 to vector<8x128xf32>
    %153 = arith.mulf %152, %151 : vector<8x128xf32>
    %cst_50 = arith.constant 1.45315206 : f32
    %154 = vector.broadcast %cst_50 : f32 to vector<8x128xf32>
    %155 = arith.subf %153, %154 : vector<8x128xf32>
    %156 = arith.mulf %155, %151 : vector<8x128xf32>
    %cst_51 = arith.constant 1.42141378 : f32
    %157 = vector.broadcast %cst_51 : f32 to vector<8x128xf32>
    %158 = arith.addf %156, %157 : vector<8x128xf32>
    %159 = arith.mulf %158, %151 : vector<8x128xf32>
    %cst_52 = arith.constant 0.284496725 : f32
    %160 = vector.broadcast %cst_52 : f32 to vector<8x128xf32>
    %161 = arith.subf %159, %160 : vector<8x128xf32>
    %162 = arith.mulf %161, %151 : vector<8x128xf32>
    %cst_53 = arith.constant 0.254829586 : f32
    %163 = vector.broadcast %cst_53 : f32 to vector<8x128xf32>
    %164 = arith.addf %162, %163 : vector<8x128xf32>
    %165 = arith.mulf %164, %151 : vector<8x128xf32>
    %cst_54 = arith.constant 0.000000e+00 : f32
    %166 = vector.broadcast %cst_54 : f32 to vector<8x128xf32>
    %167 = arith.subf %166, %145 : vector<8x128xf32>
    %168 = arith.mulf %167, %145 : vector<8x128xf32>
    %169 = math.exp %168 : vector<8x128xf32>
    %170 = arith.mulf %165, %169 : vector<8x128xf32>
    %cst_55 = arith.constant 1.000000e+00 : f32
    %171 = vector.broadcast %cst_55 : f32 to vector<8x128xf32>
    %172 = arith.subf %171, %170 : vector<8x128xf32>
    %cst_56 = arith.constant 0.000000e+00 : f32
    %173 = vector.broadcast %cst_56 : f32 to vector<8x128xf32>
    %174 = arith.cmpf olt, %144, %173 : vector<8x128xf32>
    %cst_57 = arith.constant 0.000000e+00 : f32
    %175 = vector.broadcast %cst_57 : f32 to vector<8x128xf32>
    %176 = arith.subf %175, %172 : vector<8x128xf32>
    %177 = arith.select %174, %176, %172 : vector<8x128xi1>, vector<8x128xf32>
    %cst_58 = arith.constant 1.000000e+00 : f32
    %178 = vector.broadcast %cst_58 : f32 to vector<8x128xf32>
    %179 = arith.addf %178, %177 : vector<8x128xf32>
    %180 = arith.mulf %142, %179 : vector<8x128xf32>
    %c0_59 = arith.constant 0 : index
    %c0_60 = arith.constant 0 : index
    %181 = vector.load %arg5[%c0_59, %c0_60] : memref<128x32xf32, #tpu.memory_space<vmem>>, vector<128x32xf32>
    %cst_61 = arith.constant dense<0.000000e+00> : vector<8x32xf32>
    %182 = tpu.matmul %180, %181, %cst_61 {dimension_numbers = #tpu.dot_dimension_numbers<[1], [0], [0], [1], [0, 0, 1, 1], [], []>} : vector<8x128xf32>, vector<128x32xf32>, vector<8x32xf32> -> vector<8x32xf32>
    %183 = vector.broadcast %11 : vector<1x32xf32> to vector<8x32xf32>
    %184 = arith.addf %182, %183 : vector<8x32xf32>
    %185 = arith.addf %115, %184 : vector<8x32xf32>
    %c0_62 = arith.constant 0 : index
    %c0_63 = arith.constant 0 : index
    %c0_64 = arith.constant 0 : index
    %186 = vector.load %arg8[%c0_62, %c0_63, %c0_64] : memref<1x8x32xf32, #tpu.memory_space<vmem>>, vector<1x8x32xf32>
    %187 = vector.shape_cast %186 : vector<1x8x32xf32> to vector<8x32xf32>
    %188 = vector.shape_cast %185 : vector<8x32xf32> to vector<1x8x32xf32>
    tpu.vector_store %arg8[%c0_62, %c0_63, %c0_64], %188 {strides = array<i32>} : memref<1x8x32xf32, #tpu.memory_space<vmem>>, vector<1x8x32xf32>,
    return
  }
  func.func @transform_0(%arg0: i32) -> (i32, i32, i32) {
    %c0_i32 = arith.constant 0 : i32
    %c0_i32_0 = arith.constant 0 : i32
    %c0_i32_1 = arith.constant 0 : i32
    return %arg0, %c0_i32, %c0_i32_0 : i32, i32, i32
  }
  func.func @transform_1(%arg0: i32) -> (i32, i32) {
    %c0_i32 = arith.constant 0 : i32
    %c0_i32_0 = arith.constant 0 : i32
    %c0_i32_1 = arith.constant 0 : i32
    return %c0_i32, %c0_i32_0 : i32, i32
  }
  func.func @transform_2(%arg0: i32) -> (i32, i32) {
    %c0_i32 = arith.constant 0 : i32
    %c0_i32_0 = arith.constant 0 : i32
    %c0_i32_1 = arith.constant 0 : i32
    return %c0_i32, %c0_i32_0 : i32, i32
  }
  func.func @transform_3(%arg0: i32) -> (i32, i32) {
    %c0_i32 = arith.constant 0 : i32
    %c0_i32_0 = arith.constant 0 : i32
    %c0_i32_1 = arith.constant 0 : i32
    return %c0_i32, %c0_i32_0 : i32, i32
  }
  func.func @transform_4(%arg0: i32) -> (i32, i32) {
    %c0_i32 = arith.constant 0 : i32
    %c0_i32_0 = arith.constant 0 : i32
    %c0_i32_1 = arith.constant 0 : i32
    return %c0_i32, %c0_i32_0 : i32, i32
  }
  func.func @transform_5(%arg0: i32) -> (i32, i32) {
    %c0_i32 = arith.constant 0 : i32
    %c0_i32_0 = arith.constant 0 : i32
    %c0_i32_1 = arith.constant 0 : i32
    return %c0_i32, %c0_i32_0 : i32, i32
  }
  func.func @transform_6(%arg0: i32) -> (i32, i32) {
    %c0_i32 = arith.constant 0 : i32
    %c0_i32_0 = arith.constant 0 : i32
    %c0_i32_1 = arith.constant 0 : i32
    return %c0_i32, %c0_i32_0 : i32, i32
  }
  func.func @transform_7(%arg0: i32) -> (i32, i32, i32) {
    %c0_i32 = arith.constant 0 : i32
    %c0_i32_0 = arith.constant 0 : i32
    %c0_i32_1 = arith.constant 0 : i32
    return %arg0, %c0_i32, %c0_i32_0 : i32, i32, i32
  }
}

</mosaic_0001>

<bundles_post_ra>
// kernel: block_forward.1
= control target key start
LH: loop header
LB: loop body
LE: loop exit
PB: predicated region body
PF: predicated region fallthrough
CT: control target
= control target key end

     0   :  { %12 = vsyncpa [#allocation3], 0  ;;  %s2219_s0 = inlined_call_operand.vmem [shape: f32[2,8,32], index: 0, kind: input, shape index: {}]   ;;  %s2220_s1 = inlined_call_operand.vmem [shape: f32[32,96], index: 1, kind: input, shape index: {}]   ;;  %s2221_s2 = inlined_call_operand.vmem [shape: f32[32,32], index: 2, kind: input, shape index: {}]   ;;  %s2222_s3 = inlined_call_operand.vmem [shape: f32[32,128], index: 3, kind: input, shape index: {}]   ;;  %s2223_s4 = inlined_call_operand.vmem [shape: f32[128,32], index: 4, kind: input, shape index: {}]   ;;  %s2224_s5 = inlined_call_operand.vmem [shape: f32[9,32], index: 5, kind: input, shape index: {}]   ;;  %s2225_s6 = inlined_call_operand.vmem [shape: f32[1,128], index: 6, kind: input, shape index: {}]   ;;  %s2226_s7 = inlined_call_operand.hbm [shape: f32[2,8,32], index: 7, kind: output, shape index: {}]  }
   0x1   :  { %14 = vsyncpa [#allocation3 + $0x1], 0  ;;  %s1903_s24 = smov 0   ;;  %s1905_s25 = smov 0  }
   0x2   :  { %s1907_s26 = smov 0   ;;  %s1909_s27 = smov 0  }
   0x3 LB: > { %s1924_s28 = sadd.s32 4294967295, %s1842_s27   ;;  %s1472_s29 = sadd.s32 4294967294, %s1842_s27   ;;  %s1842_s27 = sphi %s1909_s27, %s2232_s27   ;;  %s1838_s26 = sphi %s1907_s26, %s2231_s26   ;;  %s1834_s25 = sphi %s1905_s25, %s2230_s25   ;;  %s1830_s24 = sphi %s1903_s24, %s2229_s24  }
   0x4   : > { %s1928_s30 = sadd.s32 1, %s1842_s27   ;;  %s179_s8 = sadd.s32 1, %s1838_s26 }
   0x5   : > { %s176_s9 = ssub.s32 %s1842_s27, %s1928_s30  ;;  %p189_p0 = scmp.ne.s32.totalorder %s1838_s26, %s1834_s25 }
   0x6   : > { %p177_p1 = scmp.eq.s32.totalorder %s176_s9, 0  ;;  %p190_p2 = scmp.eq.s32.totalorder %s1924_s28, 1 }
   0x7   : > { %p195_p3 = scmp.ne.s32.totalorder %s1834_s25, %s1830_s24  ;;  %p196_p4 = scmp.eq.s32.totalorder %s1472_s29, 1 }
   0x8   : > { %s1939_s10 = scalar_select %p177_p1, %s1838_s26, %s179_s8  }
   0x9   : > { %p1941_p5 = por %p190_p2, %p189_p0  ;;  %p1945_p6 = por %p196_p4, %p195_p3 }
   0xa   : > { %p1475_p7 = scmp.ge.s32.totalorder %s1842_s27, 1  ;;  %p239_p8 = scmp.lt.s32.totalorder %s1842_s27, 3 }
   0xc   : > { %p240_p9 = pnand %p1475_p7, %p239_p8 }
   0xd   : > { %p270_p10 = scmp.lt.s32.totalorder (!%p240_p9), %s1924_s28, 1  ;;  %vm277_vm0 = vcmask (!%p240_p9), 261120   ;;  %v302_v7 = vld [vmem:[%s2220_s1] sm:$0xff] (!%p240_p9)  ;;  %v303_v8 = vld [vmem:[%s2220_s1 + $0x8] sm:$0xff] (!%p240_p9)  ;;  %v304_v9 = vld [vmem:[%s2220_s1 + $0x10] sm:$0xff] (!%p240_p9)  ;;  %v1844_v10 = vmov (!%p240_p9), 0.0|0.0   ;;  %v292_v15 = vlaneseq (!%p240_p9) }
   0xe   : > { %243 = sbr.rel (%p240_p9) target bundleno = 2568 (0xa08), region = 48  ;;  %1657 = vmatprep.subr.bf16.mxu1 (!%p240_p9), %v1844_v10  ;;  %v1658_v11 = vpack.c.bf16 (!%p240_p9), %v303_v8, %v302_v7  ;;  %v305_v12 = vld [vmem:[%s2220_s1 + $0x18] sm:$0xff] (!%p240_p9)  ;;  %vm1845_vm1 = vmmov (!%p240_p9), 0   ;;  %v1846_v13 = vmov (!%p240_p9), 0.0   ;;  %v1989_v18 = vld [vmem:[%s2224_s5] sm:$0xff] (!%p240_p9)  ;;  %s1848_s15 = smov (!%p240_p9), 88  }
   0xf   : > { %1557 = vmatprep.mubr.msk.f32.mxu1 (!%p240_p9), %vm1845_vm1, %v1846_v13  ;;  %1570 = vmatprep.subr.mxu0 (!%p240_p9), %v1846_v13  ;;  %v1661_v14 = vpack.c.bf16 (!%p240_p9), %v305_v12, %v304_v9  ;;  %v1983_v16 = vshrl.u32 (!%p240_p9), %v292_v15, 7  ;;  %s1849_s16 = smov (!%p240_p9), 96   ;;  %s1851_s18 = smov (!%p240_p9), 80   ;;  %vm410_vm2 = vcmask (!%p240_p9), 64512   ;;  %v405_v45 = vand.u32 (!%p240_p9), 127, %v292_v15 }
  0x10   : > { %1572 = vmatprep.mubr.msk.f32.mxu0 (!%p240_p9), %vm1845_vm1, %v1846_v13  ;;  %1659 = vmatpush3.bf16.msra.mxu1 (!%p240_p9), %v1658_v11  ;;  %s1852_s19 = smov (!%p240_p9), 112   ;;  %s1853_s20 = smov (!%p240_p9), 72   ;;  %vm1086_vm4 = vcmask (!%p240_p9), 130048   ;;  %vm1088_vm5 = vcmask (!%p240_p9), 195584  }
  0x11   : > { %1660 = vmatprep.subr.bf16.mxu1 (!%p240_p9), %v1844_v10  ;;  %v386_v17 = vsub.s32 (!%p240_p9), 5, %v1983_v16  ;;  %v294_v23 = vsub.s32 (!%p240_p9), 0, %v1983_v16  ;;  %v299_v24 = vsub.s32 (!%p240_p9), 1, %v1983_v16  ;;  %v381_v31 = vsub.s32 (!%p240_p9), 4, %v1983_v16  ;;  %s1854_s21 = smov (!%p240_p9), 104   ;;  %s1855_s22 = smov (!%p240_p9), 64  }
  0x12   : > { %vm406_vm3 = vcmp.le.s32.totalorder (!%p240_p9), %v405_v45, %v1983_v16  ;;  %v395_v62 = vsub.s32 (!%p240_p9), 6, %v1983_v16  ;;  %s1856_s23 = smov (!%p240_p9), 56   ;;  %s1857_s29 = smov (!%p240_p9), 48  }
  0x13   : > { %v387_v19 = vrot.slane (!%p240_p9), %v1989_v18, %v386_v17  ;;  %v295_v25 = vrot.slane (!%p240_p9), %v1989_v18, %v294_v23  ;;  %v300_v28 = vrot.slane (!%p240_p9), %v1989_v18, %v299_v24  ;;  %v382_v34 = vrot.slane (!%p240_p9), %v1989_v18, %v381_v31  ;;  %s1858_s8 = smov (!%p240_p9), 40  }
  0x14   : > { %1662 = vmatpush3.bf16.msra.mxu1 (!%p240_p9), %v1661_v14  ;;  %v396_v63 = vrot.slane (!%p240_p9), %v1989_v18, %v395_v62 }
  0x15   : > { %s271_s13 = scalar_select %p270_p10, %s1924_s28, 1  ;;  %1560 = vmatprep.subr.mxu1 %v1846_v13 }
  0x17   : > { %s1477_s14 = sshll.u32 %s271_s13, 3  ;;  %s1498_s13 = sshll.u32 %s1924_s28, 7 }
  0x18   : > { %s273_s17 = scalar_lea.vmem %s2219_s0, %s1477_s14  ;;  %s1847_s14 = smov 32  }
  0x19   : > { %v1956_v0 = vld [vmem:[%s273_s17] sm:$0xff]  ;;  %389 = vrot.lane.b32.xlu1 %v387_v19, %s1847_s14  ;;  %s1850_s17 = smov 120  }
  0x1a   : > { %v278_v1 = vsel %vm277_vm0, %v1956_v0, 0.0 }
  0x1b   : > { %279 = vadd.xlane.f32.xlu0 %v278_v1 }
  0x8b   : > { %v390_v32 = vpop.permute.xlu1 %389 }
  0xa8   : > { %v280_v2 = vpop.xlane.xlu0 %279 }
  0xa9   : > { %v282_v3 = vmul.f32 0.03125, %v280_v2 }
  0xab   : > { %v283_v4 = vsub.f32 %v1956_v0, %v282_v3 }
  0xad   : > { %v284_v5 = vmul.f32 %v283_v4, %v283_v4 }
  0xaf   : > { %v285_v6 = vsel %vm277_vm0, %v284_v5, 0.0 }
  0xb0   : > { %286 = vadd.xlane.f32.xlu0 %v285_v6 }
 0x13d   : > { %v287_v20 = vpop.xlane.xlu0 %286 }
 0x13e   : > { %v288_v21 = vmul.f32 0.03125, %v287_v20 }
 0x140   : > { %v289_v22 = vadd.f32 1e-05, %v288_v21 }
 0x142   : > { %1756 = vrsqrt.f32 %v289_v22 }
 0x14c   : > { %v1757_v26 = vpop.eup %1756 }
 0x14d   : > { %v291_v27 = vmul.f32 %v1757_v26, %v283_v4 }
 0x14f   : > { %v296_v29 = vmul.f32 %v295_v25, %v291_v27 }
 0x151   : > { %v301_v30 = vadd.f32 %v300_v28, %v296_v29 }
 0x153   : > { %1558 = vmatmul.mubr.msk.f32.vlgmr.msra.gmra.mrb[0].mxu1 %vm277_vm0, %v301_v30 }
 0x154   : > { %1562 = vmatprep.mubr.msk.f32.mxu1 %vm1845_vm1, %v1846_v13 }
 0x226   : > { %v2000_v33 = vpop.f32.mrb[0].mxu1 }
 0x227   : > { %v392_v35 = vadd.f32 %v390_v32, %v2000_v33  ;;  %v1559_v36 = vpop.f32.mrb[1].mxu1  ;;  %v383_v37 = vadd.f32 %v382_v34, %v2000_v33 }
 0x229   : > { %577 = vrot.lane.b32.xlu0 %v392_v35, %s1848_s15  ;;  %408 = vrot.lane.b32.xlu1 %v392_v35, %s1849_s16 }
 0x22d   : > { %575 = vrot.lane.b32.xlu1 %v383_v37, %s1850_s17 }
 0x231   : > { %743 = vrot.lane.b32.xlu1 %v392_v35, %s1851_s18  ;;  %s2176_s18 = scalar_lea.hbm %s2226_s7, %s1498_s13 }
 0x235   : > { %741 = vrot.lane.b32.xlu1 %v383_v37, %s1852_s19 }
 0x239   : > { %909 = vrot.lane.b32.xlu1 %v392_v35, %s1853_s20  ;;  %s1859_s20 = smov 8  }
 0x23d   : > { %907 = vrot.lane.b32.xlu1 %v383_v37, %s1854_s21  ;;  %s1860_s21 = smov 16  }
 0x29b   : > { %v578_v38 = vpop.permute.xlu0 %577  ;;  %v409_v39 = vpop.permute.xlu1 %408 }
 0x29c   : > { %1561 = vmatpush3.xpose.msk.msra.mxu1 %vm410_vm2, %v409_v39  ;;  %1571 = vmatpush3.xpose.msk.msra.mxu0 %vm410_vm2, %v578_v38 }
 0x29d   : > { %1580 = vmatprep.subr.mxu0 %v1846_v13  ;;  %1565 = vmatprep.subr.mxu1 %v1846_v13 }
 0x29f   : > { %v576_v40 = vpop.permute.xlu1 %575  ;;  %1563 = vmatmul.mubr.msk.f32.vlgmr.msra.gmra.mrb[2].mxu1 %vm410_vm2, %v383_v37 }
 0x2a0   : > { %1573 = vmatmul.mubr.msk.f32.vlgmr.msra.gmra.mrb[0].mxu0 %vm410_vm2, %v576_v40  ;;  %1567 = vmatprep.mubr.msk.f32.mxu1 %vm1845_vm1, %v1846_v13 }
 0x2a1   : > { %1582 = vmatprep.mubr.msk.f32.mxu0 %vm1845_vm1, %v1846_v13 }
 0x2a3   : > { %v744_v41 = vpop.permute.xlu1 %743 }
 0x2a4   : > { %1581 = vmatpush3.xpose.msk.msra.mxu0 %vm410_vm2, %v744_v41 }
 0x2a5   : > { %1590 = vmatprep.subr.mxu0 %v1846_v13 }
 0x2a7   : > { %v742_v42 = vpop.permute.xlu1 %741 }
 0x2a8   : > { %1583 = vmatmul.mubr.msk.f32.vlgmr.msra.gmra.mrb[2].mxu0 %vm410_vm2, %v742_v42 }
 0x2a9   : > { %1592 = vmatprep.mubr.msk.f32.mxu0 %vm1845_vm1, %v1846_v13 }
 0x2ab   : > { %v910_v43 = vpop.permute.xlu1 %909 }
 0x2ac   : > { %1591 = vmatpush3.xpose.msk.msra.mxu0 %vm410_vm2, %v910_v43  ;;  %v1090_v43 = vld [vmem:[%s2221_s2] sm:$0xff] }
 0x2ad   : > { %1675 = vmatprep.subr.bf16.mxu0 %v1844_v10 }
 0x2af   : > { %v908_v44 = vpop.permute.xlu1 %907 }
 0x2b0   : > { %1593 = vmatmul.mubr.msk.f32.vlgmr.msra.gmra.mrb[4].mxu0 %vm410_vm2, %v908_v44  ;;  %v1091_v44 = vld [vmem:[%s2221_s2 + $0x8] sm:$0xff] }
 0x2b1   : > { %1654 = vmatprep.mubr.msk.f32.mxu0 %vm1845_vm1, %v1846_v13  ;;  %v1664_v45 = vpack.c.bf16 %v1091_v44, %v1090_v43  ;;  %v1317_v44 = vld [vmem:[%s2223_s4 + $0x50] sm:$0xff] }
 0x372   : > { %v482_v46 = vpop.f32.mrb[2].mxu1 }
 0x373   : > { %v486_v47 = vsel %vm406_vm3, %v482_v46, -1e+30  ;;  %v1564_v48 = vpop.f32.mrb[3].mxu1  ;;  %v649_v49 = vpop.f32.mrb[0].mxu0  ;;  %v1092_v46 = vld [vmem:[%s2221_s2 + $0x10] sm:$0xff] }
 0x374   : > { %v653_v50 = vsel %vm406_vm3, %v649_v49, -1e+30  ;;  %v1574_v51 = vpop.f32.mrb[1].mxu0  ;;  %v487_v52 = vsel %vm410_vm2, %v486_v47, -inf }
 0x375   : > { %488 = vmax.xlane.f32.xlu1 %v487_v52  ;;  %v654_v53 = vsel %vm410_vm2, %v653_v50, -inf }
 0x376   : > { %655 = vmax.xlane.f32.xlu0 %v654_v53 }
 0x37b   : > { %v815_v54 = vpop.f32.mrb[2].mxu0 }
 0x37c   : > { %v819_v55 = vsel %vm406_vm3, %v815_v54, -1e+30  ;;  %v1584_v56 = vpop.f32.mrb[3].mxu0 }
 0x37d   : > { %v820_v57 = vsel %vm410_vm2, %v819_v55, -inf }
 0x37e   : > { %821 = vmax.xlane.f32.xlu0 %v820_v57 }
 0x383   : > { %v981_v58 = vpop.f32.mrb[4].mxu0 }
 0x384   : > { %v985_v59 = vsel %vm406_vm3, %v981_v58, -1e+30  ;;  %v1594_v60 = vpop.f32.mrb[5].mxu0 }
 0x385   : > { %v986_v61 = vsel %vm410_vm2, %v985_v59, -inf }
 0x386   : > { %987 = vmax.xlane.f32.xlu1 %v986_v61 }
 0x394   : > { %398 = vrot.lane.b32.xlu0 %v396_v63, %s1855_s22  ;;  %v1170_v63 = vsub.s32 7, %v1983_v16 }
 0x402   : > { %v489_v1 = vpop.xlane.xlu1 %488 }
 0x403   : > { %v490_v2 = vsub.f32 %v486_v47, %v489_v1  ;;  %v656_v3 = vpop.xlane.xlu0 %655  ;;  %v1093_v47 = vld [vmem:[%s2221_s2 + $0x18] sm:$0xff]  ;;  %v1171_v1 = vrot.slane %v1989_v18, %v1170_v63 }
 0x404   : > { %v657_v4 = vsub.f32 %v653_v50, %v656_v3  ;;  %v1667_v48 = vpack.c.bf16 %v1093_v47, %v1092_v46  ;;  %v1319_v47 = vld [vmem:[%s2223_s4 + $0x60] sm:$0xff] }
 0x405   : > { %v491_v5 = vmul.f32 1.442695, %v490_v2 }
 0x406   : > { %v658_v6 = vmul.f32 1.442695, %v657_v4 }
 0x407   : > { %1758 = vpow2.f32 %v491_v5 }
 0x408   : > { %1760 = vpow2.f32 %v658_v6 }
 0x40b   : > { %v822_v7 = vpop.xlane.xlu0 %821 }
 0x40c   : > { %v823_v8 = vsub.f32 %v819_v55, %v822_v7 }
 0x40e   : > { %v824_v9 = vmul.f32 1.442695, %v823_v8 }
 0x40f   : > { %v399_v11 = vpop.permute.xlu0 %398 }
 0x410   : > { %1762 = vpow2.f32 %v824_v9  ;;  %v401_v12 = vadd.f32 %v399_v11, %v2000_v33 }
 0x411   : > { %v1759_v14 = vpop.eup %1758 }
 0x412   : > { %665 = vrot.lane.b32.xlu0 %v401_v12, %s1856_s23  ;;  %v493_v15 = vsel %vm410_vm2, %v1759_v14, 0.0  ;;  %v1761_v17 = vpop.eup %1760  ;;  %s267_s23 = sand.u32 1, %s1834_s25  }
 0x413   : > { %494 = vadd.xlane.f32.xlu1 %v493_v15  ;;  %v988_v19 = vpop.xlane.xlu1 %987  ;;  %v660_v22 = vsel %vm410_vm2, %v1761_v17, 0.0  ;;  %v1198_v15 = vld [vmem:[%s2222_s3 + $0x10] sm:$0xff]  ;;  %s1400_s19 = scalar_lea.sflag [#allocation3], %s267_s23 }
 0x414   : > { %v989_v20 = vsub.f32 %v985_v59, %v988_v19 }
 0x416   : > { %v990_v21 = vmul.f32 1.442695, %v989_v20  ;;  %831 = vrot.lane.b32.xlu0 %v401_v12, %s1857_s29  ;;  %s1476_s29 = sshll.u32 %s267_s23, 3 }
 0x417   : > { %661 = vadd.xlane.f32.xlu1 %v660_v22  ;;  %s269_s14 = scalar_lea.vmem [#allocation2], %s1476_s29 }
 0x418   : > { %1764 = vpow2.f32 %v990_v21  ;;  %s1413_s15 = sshll.u32 %s269_s14, 4  ;;  %s2178_s15 = int_to_ptr.vmem [resolvable:$true] %s1413_s15 }
 0x419   : > { %s1780_s28 = scalar_lea.vmem %s2178_s15, 128 }
 0x41a   : > { %v1763_v23 = vpop.eup %1762  ;;  %997 = vrot.lane.b32.xlu0 %v401_v12, %s1858_s8  ;;  %p1781_p11 = scmp.ne.s32.totalorder %s2178_s15, %s1780_s28 }
 0x41b   : > { %v826_v24 = vsel %vm410_vm2, %v1763_v23, 0.0 }
 0x41c   : > { %827 = vadd.xlane.f32.xlu1 %v826_v24  ;;  %v1193_v24 = vsub.s32 3, %v1983_v16  ;;  %p1782_p12 = pnand %p1781_p11, %p1941_p5 }
 0x41e   : > { %p1783_p13 = pneg %p1782_p12 }
 0x422   : > { %v1765_v25 = vpop.eup %1764 }
 0x423   : > { %v992_v26 = vsel %vm410_vm2, %v1765_v25, 0.0 }
 0x424   : > { %993 = vadd.xlane.f32.xlu1 %v992_v26 }
 0x435   : > { %499 = vrot.lane.b32.xlu1 %v401_v12, %s1855_s22  ;;  %s1861_s22 = smov 24   ;;  %v1196_v12 = vld [vmem:[%s2222_s3] sm:$0xff] }
 0x484   : > { %v666_v32 = vpop.permute.xlu0 %665 }
 0x488   : > { %v832_v36 = vpop.permute.xlu0 %831 }
 0x48c   : > { %v998_v41 = vpop.permute.xlu0 %997 }
 0x4a0   : > { %v495_v27 = vpop.xlane.xlu1 %494 }
 0x4a1   : > { %1766 = vrcp.f32 %v495_v27 }
 0x4a4   : > { %v662_v28 = vpop.xlane.xlu1 %661 }
 0x4a5   : > { %1768 = vrcp.f32 %v662_v28  ;;  %v1194_v28 = vrot.slane %v1989_v18, %v1193_v24 }
 0x4a9   : > { %v828_v29 = vpop.xlane.xlu1 %827 }
 0x4aa   : > { %1770 = vrcp.f32 %v828_v29 }
 0x4ab   : > { %v1767_v31 = vpop.eup %1766 }
 0x4ac   : > { %v497_v33 = vmul.f32 %v1767_v31, %v1759_v14  ;;  %v1307_v31 = vld [vmem:[%s2223_s4] sm:$0xff] }
 0x4af   : > { %v1769_v35 = vpop.eup %1768 }
 0x4b0   : > { %v664_v37 = vmul.f32 %v1769_v35, %v1761_v17  ;;  %v1199_v17 = vld [vmem:[%s2222_s3 + $0x18] sm:$0xff]  ;;  %v1311_v35 = vld [vmem:[%s2223_s4 + $0x20] sm:$0xff] }
 0x4b1   : > { %v994_v30 = vpop.xlane.xlu1 %993  ;;  %v1673_v19 = vpack.c.bf16 %v1199_v17, %v1198_v15 }
 0x4b2   : > { %1772 = vrcp.f32 %v994_v30 }
 0x4b4   : > { %v1771_v38 = vpop.eup %1770 }
 0x4b5   : > { %v500_v34 = vpop.permute.xlu1 %499  ;;  %v830_v39 = vmul.f32 %v1771_v38, %v1763_v23  ;;  %v1188_v23 = vsub.s32 2, %v1983_v16  ;;  %v1309_v16 = vld [vmem:[%s2223_s4 + $0x10] sm:$0xff] }
 0x4b6   : > { %1566 = vmatpush3.msra.mxu1 %v500_v34  ;;  %v1313_v38 = vld [vmem:[%s2223_s4 + $0x30] sm:$0xff] }
 0x4b7   : > { %1568 = vmatmul.mubr.msk.f32.vlgmr.msra.gmra.mrb[4].mxu1 %vm410_vm2, %v497_v33  ;;  %1575 = vmatprep.subr.mxu1 %v1846_v13 }
 0x4b8   : > { %1576 = vmatpush3.msra.mxu1 %v666_v32  ;;  %1577 = vmatprep.mubr.msk.f32.mxu1 %vm1845_vm1, %v1846_v13  ;;  %v1308_v32 = vld [vmem:[%s2223_s4 + $0x8] sm:$0xff] }
 0x4b9   : > { %1585 = vmatprep.subr.mxu1 %v1846_v13  ;;  %v1676_v33 = vpack.c.bf16 %v1308_v32, %v1307_v31 }
 0x4bb   : > { %1578 = vmatmul.mubr.msk.f32.vlgmr.msra.gmra.mrb[6].mxu1 %vm410_vm2, %v664_v37  ;;  %1677 = vmatpush3.bf16.msra.mxu0 %v1676_v33 }
 0x4bc   : > { %1586 = vmatpush3.msra.mxu1 %v832_v36  ;;  %1587 = vmatprep.mubr.msk.f32.mxu1 %vm1845_vm1, %v1846_v13  ;;  %v1773_v40 = vpop.eup %1772  ;;  %v1312_v36 = vld [vmem:[%s2223_s4 + $0x28] sm:$0xff] }
 0x4bd   : > { %1595 = vmatprep.subr.mxu1 %v1846_v13  ;;  %v996_v42 = vmul.f32 %v1773_v40, %v1765_v25  ;;  %v1189_v25 = vrot.slane %v1989_v18, %v1188_v23  ;;  %1678 = vmatprep.subr.bf16.mxu0 %v1844_v10  ;;  %v1310_v18 = vld [vmem:[%s2223_s4 + $0x18] sm:$0xff]  ;;  %v1682_v37 = vpack.c.bf16 %v1312_v36, %v1311_v35 }
 0x4be   : > { %v1679_v34 = vpack.c.bf16 %v1310_v18, %v1309_v16 }
 0x4bf   : > { %1588 = vmatmul.mubr.msk.f32.vlgmr.msra.gmra.mrb[8].mxu1 %vm410_vm2, %v830_v39  ;;  %v1314_v39 = vld [vmem:[%s2223_s4 + $0x38] sm:$0xff] }
 0x4c0   : > { %1596 = vmatpush3.msra.mxu1 %v998_v41  ;;  %1597 = vmatprep.mubr.msk.f32.mxu1 %vm1845_vm1, %v1846_v13  ;;  %v1685_v40 = vpack.c.bf16 %v1314_v39, %v1313_v38  ;;  %v1315_v41 = vld [vmem:[%s2223_s4 + $0x40] sm:$0xff] }
 0x4c1   : > { %1663 = vmatprep.subr.bf16.mxu1 %v1844_v10  ;;  %1680 = vmatpush3.bf16.msra.mxu0 %v1679_v34 }
 0x4c2   : > { %1681 = vmatprep.subr.bf16.mxu0 %v1844_v10 }
 0x4c3   : > { %1598 = vmatmul.mubr.msk.f32.vlgmr.msra.gmra.mrb[10].mxu1 %vm410_vm2, %v996_v42  ;;  %v1316_v42 = vld [vmem:[%s2223_s4 + $0x48] sm:$0xff] }
 0x4c4   : > { %1608 = vmatprep.mubr.msk.f32.mxu1 %vm1845_vm1, %v1846_v13  ;;  %1665 = vmatpush3.bf16.msra.mxu1 %v1664_v45  ;;  %v1688_v43 = vpack.c.bf16 %v1316_v42, %v1315_v41  ;;  %v1318_v45 = vld [vmem:[%s2223_s4 + $0x58] sm:$0xff] }
 0x4c5   : > { %1666 = vmatprep.subr.bf16.mxu1 %v1844_v10  ;;  %1683 = vmatpush3.bf16.msra.mxu0 %v1682_v37  ;;  %v1691_v46 = vpack.c.bf16 %v1318_v45, %v1317_v44 }
 0x4c6   : > { %1684 = vmatprep.subr.bf16.mxu0 %v1844_v10 }
 0x4c8   : > { %1668 = vmatpush3.bf16.msra.mxu1 %v1667_v48  ;;  %v1320_v48 = vld [vmem:[%s2223_s4 + $0x68] sm:$0xff] }
 0x4c9   : > { %1669 = vmatprep.subr.bf16.mxu1 %v1844_v10  ;;  %1686 = vmatpush3.bf16.msra.mxu0 %v1685_v40 }
 0x4ca   : > { %1687 = vmatprep.subr.bf16.mxu0 %v1844_v10 }
 0x4cd   : > { %1689 = vmatpush3.bf16.msra.mxu0 %v1688_v43 }
 0x4ce   : > { %1690 = vmatprep.subr.bf16.mxu0 %v1844_v10 }
 0x4d1   : > { %1692 = vmatpush3.bf16.msra.mxu0 %v1691_v46 }
 0x4d2   : > { %1693 = vmatprep.subr.bf16.mxu0 %v1844_v10 }
 0x58a   : > { %v571_v49 = vpop.f32.mrb[4].mxu1 }
 0x58b   : > { %v1569_v50 = vpop.f32.mrb[5].mxu1 }
 0x58c   : > { %v1321_v50 = vld [vmem:[%s2223_s4 + $0x70] sm:$0xff] }
 0x58e   : > { %v737_v51 = vpop.f32.mrb[6].mxu1 }
 0x58f   : > { %1074 = vrot.lane.b32.xlu0 %v737_v51, %s1859_s20  ;;  %v1579_v52 = vpop.f32.mrb[7].mxu1  ;;  %v1322_v51 = vld [vmem:[%s2223_s4 + $0x78] sm:$0xff]  ;;  %s1862_s20 = smov [#allocation2]  }
 0x590   : > { %v1697_v52 = vpack.c.bf16 %v1322_v51, %v1321_v50 }
 0x592   : > { %v903_v53 = vpop.f32.mrb[8].mxu1 }
 0x593   : > { %1078 = vrot.lane.b32.xlu1 %v903_v53, %s1860_s21  ;;  %v1589_v54 = vpop.f32.mrb[9].mxu1  ;;  %v1492_v53 = vld [vmem:[%s2225_s6] ss:$0 sm:$0xff]  ;;  %s1784_s21 = sshll.u32 %s1862_s20, 4  ;;  %s1785_s21 = int_to_ptr.vmem [resolvable:$false] %s1784_s21 }
 0x594   : > { %p1787_p0 = scmp.lt.s32.totalorder %s2178_s15, %s1785_s21 }
 0x596   : > { %v1069_v55 = vpop.f32.mrb[10].mxu1 }
 0x597   : > { %1082 = vrot.lane.b32.xlu0 %v1069_v55, %s1861_s22  ;;  %v1599_v56 = vpop.f32.mrb[11].mxu1  ;;  %s1786_s22 = scalar_lea.vmem %s1785_s21, 256 }
 0x598   : > { %p1788_p1 = scmp.lt.s32.totalorder %s1786_s22, %s1780_s28 }
 0x59a   : > { %p1789_p2 = por %p1788_p1, %p1787_p0 }
 0x59c   : > { %p1790_p3 = pnand %p1789_p2, %p1783_p13 }
 0x601   : > { %v1075_v57 = vpop.permute.xlu0 %1074 }
 0x602   : > { %v1085_v59 = vsel %vm410_vm2, %v571_v49, %v1075_v57  ;;  %v1694_v49 = vpack.c.bf16 %v1320_v48, %v1319_v47 }
 0x604   : > { %1695 = vmatpush3.bf16.msra.mxu0 %v1694_v49 }
 0x605   : > { %v1079_v58 = vpop.permute.xlu1 %1078  ;;  %1696 = vmatprep.subr.bf16.mxu0 %v1844_v10 }
 0x606   : > { %v1087_v60 = vsel %vm1086_vm4, %v1085_v59, %v1079_v58 }
 0x608   : > { %1698 = vmatpush3.bf16.msra.mxu0 %v1697_v52 }
 0x609   : > { %v1083_v61 = vpop.permute.xlu0 %1082 }
 0x60a   : > { %v1089_v62 = vsel %vm1088_vm5, %v1087_v60, %v1083_v61 }
 0x60b   : > { %1609 = vmatmul.mubr.msk.f32.vlgmr.msra.gmra.mrb[12].mxu1 %vm277_vm0, %v1089_v62 }
 0x60c   : > { %1619 = vmatprep.mubr.msk.f32.mxu1 %vm1845_vm1, %v1846_v13 }
 0x6de   : > { %v1163_v2 = vpop.f32.mrb[12].mxu1 }
 0x6df   : > { %v1167_v3 = vadd.f32 %v1163_v2, %v1956_v0  ;;  %v1610_v4 = vpop.f32.mrb[13].mxu1  ;;  %v1197_v0 = vld [vmem:[%s2222_s3 + $0x8] sm:$0xff] }
 0x6e0   : > { %v1670_v14 = vpack.c.bf16 %v1197_v0, %v1196_v12 }
 0x6e1   : > { %v2085_v5 = vadd.f32 %v1171_v1, %v1167_v3 }
 0x6e2   : > { %1671 = vmatpush3.bf16.msra.mxu1 %v1670_v14 }
 0x6e3   : > { %v1173_v6 = vsel %vm277_vm0, %v2085_v5, 0.0  ;;  %1672 = vmatprep.subr.bf16.mxu1 %v1844_v10 }
 0x6e4   : > { %1174 = vadd.xlane.f32.xlu1 %v1173_v6 }
 0x6e6   : > { %1674 = vmatpush3.bf16.msra.mxu1 %v1673_v19 }
 0x771   : > { %v1175_v7 = vpop.xlane.xlu1 %1174 }
 0x772   : > { %v1176_v8 = vmul.f32 0.03125, %v1175_v7 }
 0x774   : > { %v1177_v9 = vsub.f32 %v2085_v5, %v1176_v8 }
 0x776   : > { %v1178_v11 = vmul.f32 %v1177_v9, %v1177_v9 }
 0x778   : > { %v1179_v13 = vsel %vm277_vm0, %v1178_v11, 0.0 }
 0x779   : > { %1180 = vadd.xlane.f32.xlu0 %v1179_v13 }
 0x806   : > { %v1181_v20 = vpop.xlane.xlu0 %1180 }
 0x807   : > { %v1182_v21 = vmul.f32 0.03125, %v1181_v20 }
 0x809   : > { %v1183_v22 = vadd.f32 1e-05, %v1182_v21  ;;  %v1496_v21 = vld [vmem:[%s2224_s5 + $0x8] ss:$0 sm:$0xff] }
 0x80b   : > { %1774 = vrsqrt.f32 %v1183_v22 }
 0x815   : > { %v1775_v26 = vpop.eup %1774 }
 0x816   : > { %v1185_v27 = vmul.f32 %v1775_v26, %v1177_v9 }
 0x818   : > { %v1190_v29 = vmul.f32 %v1189_v25, %v1185_v27 }
 0x81a   : > { %v1195_v30 = vadd.f32 %v1194_v28, %v1190_v29 }
 0x81c   : > { %1620 = vmatmul.mubr.msk.f32.vlgmr.msra.gmra.mrb[14].mxu1 %vm277_vm0, %v1195_v30 }
 0x8ef   : > { %v1276_v54 = vpop.f32.mrb[14].mxu1 }
 0x8f0   : > { %v1277_v55 = vadd.f32 %v1492_v53, %v1276_v54  ;;  %v1621_v56 = vpop.f32.mrb[15].mxu1 }
 0x8f2   : > { %v1281_v57 = vmul.f32 0.70710677, %v1277_v55  ;;  %v1280_v17 = vmul.f32 0.5, %v1277_v55 }
 0x8f4   : > { %v1282_v58 = vand.u32 2147483647, %v1281_v57  ;;  %vm1302_vm6 = vcmp.lt.f32.partialorder %v1281_v57, 0.0 }
 0x8f6   : > { %v1283_v10 = vmul.f32 0.3275911, %v1282_v58  ;;  %v1296_v60 = vsub.f32 0.0, %v1282_v58 }
 0x8f8   : > { %v1284_v59 = vadd.f32 1.0, %v1283_v10  ;;  %v1297_v62 = vmul.f32 %v1296_v60, %v1282_v58 }
 0x8fa   : > { %1776 = vrcp.f32 %v1284_v59  ;;  %v1298_v2 = vmul.f32 1.442695, %v1297_v62 }
 0x8fc   : > { %1778 = vpow2.f32 %v1298_v2 }
 0x904   : > { %v1777_v61 = vpop.eup %1776 }
 0x905   : > { %v1287_v63 = vmul.f32 1.0614054, %v1777_v61 }
 0x906   : > { %v1779_v13 = vpop.eup %1778 }
 0x907   : > { %v1494_v1 = vadd.f32 -1.4531521, %v1287_v63 }
 0x909   : > { %v1289_v3 = vmul.f32 %v1777_v61, %v1494_v1 }
 0x90b   : > { %v1290_v4 = vadd.f32 1.4214138, %v1289_v3 }
 0x90d   : > { %v1291_v6 = vmul.f32 %v1777_v61, %v1290_v4 }
 0x90f   : > { %v1495_v7 = vadd.f32 -0.28449672, %v1291_v6 }
 0x911   : > { %v1293_v8 = vmul.f32 %v1777_v61, %v1495_v7 }
 0x913   : > { %v1294_v9 = vadd.f32 0.2548296, %v1293_v8 }
 0x915   : > { %v1295_v11 = vmul.f32 %v1777_v61, %v1294_v9 }
 0x917   : > { %v1300_v12 = vmul.f32 %v1779_v13, %v1295_v11 }
 0x919   : > { %v1301_v0 = vsub.f32 1.0, %v1300_v12 }
 0x91b   : > { %v1303_v14 = vsub.f32 0.0, %v1301_v0 }
 0x91d   : > { %v1304_v15 = vsel %vm1302_vm6, %v1303_v14, %v1301_v0 }
 0x91e   : > { %v1305_v19 = vadd.f32 1.0, %v1304_v15 }
 0x920   : > { %v1306_v20 = vmul.f32 %v1305_v19, %v1280_v17 }
 0x922   : > { %1655 = vmatmul.mubr.f32.vlgmr.msra.gmra.mrb[6].mxu0 %v1306_v20 }
 0x9f5   : > { %v1393_v22 = vpop.f32.mrb[6].mxu0 }
 0x9f6   : > { %v1394_v23 = vadd.f32 %v1496_v21, %v1393_v22  ;;  %v1656_v24 = vpop.f32.mrb[7].mxu0 }
 0x9f8   : > { %v1397_v25 = vadd.f32 %v1394_v23, %v2085_v5 }
 0x9fa   : > { %1398 = vst.msk [vmem:[%s269_s14] sm:$0xff] %vm277_vm0, %v1397_v25 }
 0x9fb   : > { %1793 = shalt.err (!%p1790_p3)
}
 0x9fc   : > { %s1794_s23 = scalar_lea.hbm %s2176_s18, 128  ;;  %s1798_s9 = scalar_lea.hbm %s2226_s7, 256 }
 0x9fd   : > { %p1795_p4 = scmp.ne.s32.totalorder %s2176_s18, %s1794_s23  ;;  %p1799_p9 = scmp.lt.u32.totalorder %s2176_s18, %s2226_s7 }
 0x9fe   : > { %p1800_p10 = scmp.lt.u32.totalorder %s1798_s9, %s1794_s23  ;;  %p1802_p12 = scmp.lt.u32.totalorder %s1794_s23, %s2176_s18 }
 0x9ff   : > { %p1796_p7 = pnand %p1795_p4, %p1941_p5 }
 0xa00   : > { %p1801_p11 = por %p1800_p10, %p1799_p9 }
 0xa01   : > { %p1797_p8 = pneg %p1796_p7 }
 0xa02   : > { %p1803_p13 = por %p1802_p12, %p1801_p11 }
 0xa04   : > { %p1804_p0 = pnand %p1803_p13, %p1797_p8 }
 0xa06   : > { %1807 = shalt.err (!%p1804_p0)
}
 0xa07   : > { %1699 = dma.vmem_to_hbm [thread:$0]  (%p1941_p5), %s2178_s15, 128, %s2176_s18, %s1400_s19  }
 0xa08 PF: > { %p1705_p1 = scmp.ge.s32.totalorder %s1842_s27, 2  ;;  %s1425_s16 = sand.u32 1, %s1830_s24  }
 0xa09   : > { %s1426_s17 = scalar_lea.sflag [#allocation3], %s1425_s16 }
 0xa0a   : > { %p1702_p2 = pnand %p1705_p1, %p1945_p6 }
 0xa0c   : > { %1825 = dma.done.wait (!%p1702_p2), %s1426_s17, 128  }
 0xa0d   : > { %1827 = vsyncadd (!%p1702_p2), %s1426_s17, 4294967168  ;;  %p17_p3 = scmp.ge.s32.totalorder %s1928_s30, 4   ;;  %s2229_s24 = smov %s1834_s25 }
 0xa0e   : > { %s2230_s25 = smov %s1838_s26  ;;  %s2231_s26 = smov %s1939_s10 }
 0xa0f   : > { %s2232_s27 = smov %s1928_s30  ;;  %19 = sbr.rel (!%p17_p3) target bundleno = 3 (0x3), region = 83 }
 0xa16   :  { %1431 = vsyncpa [#allocation3], 1 }
 0xa17   :  { %1433 = vsyncpa [#allocation3 + $0x1], 1 }

</bundles_post_ra>
